<compile_context>
chip_gen: v5e
topology: v5e:2x2
jax: 0.10.0
libtpu: 0.0.40
codegen_flags: <defaults>
</compile_context>

<pallas_src>
import math
import numpy as np
import jax
import jax.numpy as jnp
from jax.experimental import pallas as pl
from jax.experimental.pallas import tpu as pltpu

# ---- dims consistent with MyTGN.__init__ (scaled down) ----
NUM_NODES     = 32
USER_FEAT     = 4
BUSINESS_FEAT = 4
RAW_MSG_DIM   = 7 + USER_FEAT + BUSINESS_FEAT      # 15
EDGE_PAD      = 16                                 # RAW_MSG_DIM padded to sublane multiple
MEMORY_DIM    = 32                                 # memory_dimension
EMBED_DIM     = 32                                 # embedding_dimension (per head)
HEADS         = 2
CONV_OUT      = EMBED_DIM * HEADS                  # 64
OUT_DIM       = 1
OUT_LANES     = 128                                # lane-dense output padding
BLOCK         = 128                                # batch rows per grid step
W_ROWS        = 2 * NUM_NODES + EDGE_PAD           # 80-row packed weight slab
BATCH         = 200                                # demo batch (padded to 256 -> grid=(2,))


def _tgn_kernel(src_ref, dst_ref, edge_ref, w_ref, b_ref, out_ref):
    # One-hot node gather via MXU-friendly matmul (no dynamic sublane indexing).
    iota = jax.lax.broadcasted_iota(jnp.int32, (BLOCK, NUM_NODES), 1)
    oh_src = (src_ref[...] == iota).astype(jnp.float32)            # (BLOCK, N)
    oh_dst = (dst_ref[...] == iota).astype(jnp.float32)            # (BLOCK, N)

    # Packed weight slab: rows [0:32] = T_src, [32:64] = T_dst, [64:80] = w_edge.
    t_src  = w_ref[0:NUM_NODES, :]
    t_dst  = w_ref[NUM_NODES:2 * NUM_NODES, :]
    w_edge = w_ref[2 * NUM_NODES:W_ROWS, :]

    out = (jnp.dot(oh_src, t_src, preferred_element_type=jnp.float32)
           + jnp.dot(oh_dst, t_dst, preferred_element_type=jnp.float32)
           + jnp.dot(edge_ref[...], w_edge, preferred_element_type=jnp.float32)
           + b_ref[...])
    out_ref[...] = out                                              # unmasked lane-dense store


def init_params(key):
    """Original (unfolded) module parameters, matching the PyTorch layout."""
    def lin(key, fan_in, fan_out):
        kw, kb = jax.random.split(key)
        bound = 1.0 / math.sqrt(fan_in)
        w = jax.random.uniform(kw, (fan_in, fan_out), jnp.float32, -bound, bound)
        b = jax.random.uniform(kb, (1, fan_out), jnp.float32, -bound, bound)
        return w, b

    keys = jax.random.split(key, 4)
    wv, bv = lin(keys[0], MEMORY_DIM, CONV_OUT)          # lin_value
    wskip, bskip = lin(keys[1], MEMORY_DIM, CONV_OUT)    # lin_skip (root weight)
    wout, bout = lin(keys[2], 2 * CONV_OUT + RAW_MSG_DIM, OUT_DIM)  # output_layer
    memory = jax.random.normal(keys[3], (NUM_NODES, MEMORY_DIM), jnp.float32)
    return dict(wv=wv, bv=bv, wskip=wskip, bskip=bskip,
                wout_src=wout[:CONV_OUT],
                wout_dst=wout[CONV_OUT:2 * CONV_OUT],
                wout_edge=wout[2 * CONV_OUT:],
                bout=bout,
                memory=memory)


def fold_params(p):
    """One-time host-side algebraic folding + packing for the kernel."""
    # Self-loop-only conv: per-head softmax over the single (self) neighbor == 1,
    # so conv(x) = lin_value(x) + lin_skip(x) -> fold into one linear, then fold
    # the memory table and the output linear through it.
    w_conv = p["wv"] + p["wskip"]                             # (32, 64)
    b_conv = p["bv"] + p["bskip"]                             # (1, 64)
    e_tbl = p["memory"] @ w_conv                              # (NUM_NODES, 64)
    t_src = e_tbl @ p["wout_src"]                             # (NUM_NODES, 1)
    t_dst = e_tbl @ p["wout_dst"]                             # (NUM_NODES, 1)
    b_total = b_conv @ (p["wout_src"] + p["wout_dst"]) + p["bout"]   # (1, 1)

    def pad_lanes(w):
        return jnp.pad(w, ((0, 0), (0, OUT_LANES - w.shape[1])))

    w_edge = jnp.pad(p["wout_edge"], ((0, EDGE_PAD - RAW_MSG_DIM), (0, 0)))  # (16, 1)
    w_slab = jnp.concatenate([pad_lanes(t_src),      # rows  0:32
                              pad_lanes(t_dst),      # rows 32:64
                              pad_lanes(w_edge)],    # rows 64:80
                             axis=0)                 # (80, 128)
    return dict(w_slab=w_slab, b_total=pad_lanes(b_total))    # (80,128), (1,128)


def mytgn_forward(folded, src, dst, ts, edge_attr):
    del ts  # unused by the forward pass (only update_state consumes it)
    batch = src.shape[0]
    n_blk = pl.cdiv(batch, BLOCK)
    b_pad = n_blk * BLOCK

    def pad_rows(x):
        return jnp.pad(x, ((0, b_pad - x.shape[0]),) + ((0, 0),) * (x.ndim - 1))

    src2 = pad_rows(src.astype(jnp.int32).reshape(batch, 1))                 # (b_pad, 1)
    dst2 = pad_rows(dst.astype(jnp.int32).reshape(batch, 1))                 # (b_pad, 1)
    edge2 = pad_rows(jnp.pad(edge_attr, ((0, 0), (0, EDGE_PAD - RAW_MSG_DIM))))  # (b_pad, 16)

    out_padded = pl.pallas_call(
        _tgn_kernel,
        out_shape=jax.ShapeDtypeStruct((b_pad, OUT_LANES), jnp.float32),
        grid=(n_blk,),
        in_specs=[
            pl.BlockSpec((BLOCK, 1), lambda i: (i, 0)),             # src idx
            pl.BlockSpec((BLOCK, 1), lambda i: (i, 0)),             # dst idx
            pl.BlockSpec((BLOCK, EDGE_PAD), lambda i: (i, 0)),      # edge_attr
            pl.BlockSpec((W_ROWS, OUT_LANES), lambda i: (0, 0)),    # weight slab (block-invariant)
            pl.BlockSpec((1, OUT_LANES), lambda i: (0, 0)),         # folded bias (block-invariant)
        ],
        out_specs=pl.BlockSpec((BLOCK, OUT_LANES), lambda i: (i, 0)),
        compiler_params=pltpu.CompilerParams(dimension_semantics=("parallel",)),
    )(src2, dst2, edge2, folded["w_slab"], folded["b_total"])
    return out_padded[:batch, :OUT_DIM]


def reference(params, src, dst, edge_attr):
    """Pure-JAX reference with the ORIGINAL (unfolded) module structure."""
    def conv(x):
        v = x @ params["wv"] + params["bv"]          # attention alpha == 1 per head
        skip = x @ params["wskip"] + params["bskip"]
        return v + skip
    es = conv(params["memory"][src])
    ed = conv(params["memory"][dst])
    return (es @ params["wout_src"] + ed @ params["wout_dst"]
            + edge_attr @ params["wout_edge"] + params["bout"])


if __name__ == "__main__":
    key = jax.random.PRNGKey(0)
    k_params, k_src, k_dst, k_ts, k_edge = jax.random.split(key, 5)

    params = init_params(k_params)
    folded = fold_params(params)

    src = jax.random.randint(k_src, (BATCH,), 0, NUM_NODES, dtype=jnp.int32)
    dst = jax.random.randint(k_dst, (BATCH,), 0, NUM_NODES, dtype=jnp.int32)
    ts = jax.random.uniform(k_ts, (BATCH,), jnp.float32, 0.0, 100.0)
    edge_attr = jax.random.normal(k_edge, (BATCH, RAW_MSG_DIM), jnp.float32)

    out = mytgn_forward(folded, src, dst, ts, edge_attr)
    out = jax.block_until_ready(out)

    ref = reference(params, src, dst, edge_attr)
    np.testing.assert_allclose(np.asarray(out), np.asarray(ref), rtol=1e-5, atol=1e-5)
    assert out.shape == (BATCH, OUT_DIM)
    print("KERNEL_OK")
</pallas_src>

<mosaic_0001>
module attributes {stable_mosaic.version = 11 : i64} {
  func.func @_tgn_kernel(%arg0: i32, %arg1: memref<128x1xi32, #tpu.memory_space<vmem>>, %arg2: memref<128x1xi32, #tpu.memory_space<vmem>>, %arg3: memref<128x16xf32, #tpu.memory_space<vmem>>, %arg4: memref<80x128xf32, #tpu.memory_space<vmem>>, %arg5: memref<1x128xf32, #tpu.memory_space<vmem>>, %arg6: memref<128x128xf32, #tpu.memory_space<vmem>>) attributes {dimension_semantics = [#tpu.dimension_semantics<parallel>], iteration_bounds = array<i64: 2>, scalar_prefetch = 0 : i64, scratch_operands = 0 : i64, tpu.core_type = #tpu.core_type<tc>, window_params = [{transform_indices = @transform_0, window_bounds = array<i64: 128, 1>}, {transform_indices = @transform_1, window_bounds = array<i64: 128, 1>}, {transform_indices = @transform_2, window_bounds = array<i64: 128, 16>}, {pipeline_mode = #tpu.pipeline_mode<synchronous>, transform_indices = @transform_3, window_bounds = array<i64: 80, 128>}, {pipeline_mode = #tpu.pipeline_mode<synchronous>, transform_indices = @transform_4, window_bounds = array<i64: 1, 128>}, {transform_indices = @transform_5, window_bounds = array<i64: 128, 128>}]} {
    %0 = tpu.iota {dimensions = array<i32: 1>} : vector<128x32xi32>
    %c0 = arith.constant 0 : index
    %c0_0 = arith.constant 0 : index
    %1 = vector.load %arg1[%c0, %c0_0] : memref<128x1xi32, #tpu.memory_space<vmem>>, vector<128x1xi32>
    %2 = vector.broadcast %1 : vector<128x1xi32> to vector<128x32xi32>
    %3 = arith.cmpi eq, %2, %0 : vector<128x32xi32>
    %4 = arith.extui %3 : vector<128x32xi1> to vector<128x32xi32>
    %5 = arith.sitofp %4 : vector<128x32xi32> to vector<128x32xf32>
    %c0_1 = arith.constant 0 : index
    %c0_2 = arith.constant 0 : index
    %6 = vector.load %arg2[%c0_1, %c0_2] : memref<128x1xi32, #tpu.memory_space<vmem>>, vector<128x1xi32>
    %7 = vector.broadcast %6 : vector<128x1xi32> to vector<128x32xi32>
    %8 = arith.cmpi eq, %7, %0 : vector<128x32xi32>
    %9 = arith.extui %8 : vector<128x32xi1> to vector<128x32xi32>
    %10 = arith.sitofp %9 : vector<128x32xi32> to vector<128x32xf32>
    %c0_3 = arith.constant 0 : index
    %c0_4 = arith.constant 0 : index
    %11 = vector.load %arg4[%c0_3, %c0_4] : memref<80x128xf32, #tpu.memory_space<vmem>>, vector<32x128xf32>
    %c32 = arith.constant 32 : index
    %c0_5 = arith.constant 0 : index
    %12 = vector.load %arg4[%c32, %c0_5] : memref<80x128xf32, #tpu.memory_space<vmem>>, vector<32x128xf32>
    %c64 = arith.constant 64 : index
    %c0_6 = arith.constant 0 : index
    %13 = vector.load %arg4[%c64, %c0_6] : memref<80x128xf32, #tpu.memory_space<vmem>>, vector<16x128xf32>
    %cst = arith.constant dense<0.000000e+00> : vector<128x128xf32>
    %14 = tpu.matmul %5, %11, %cst {dimension_numbers = #tpu.dot_dimension_numbers<[1], [0], [0], [1], [0, 0, 1, 1], [], []>} : vector<128x32xf32>, vector<32x128xf32>, vector<128x128xf32> -> vector<128x128xf32>
    %cst_7 = arith.constant dense<0.000000e+00> : vector<128x128xf32>
    %15 = tpu.matmul %10, %12, %cst_7 {dimension_numbers = #tpu.dot_dimension_numbers<[1], [0], [0], [1], [0, 0, 1, 1], [], []>} : vector<128x32xf32>, vector<32x128xf32>, vector<128x128xf32> -> vector<128x128xf32>
    %16 = arith.addf %14, %15 : vector<128x128xf32>
    %c0_8 = arith.constant 0 : index
    %c0_9 = arith.constant 0 : index
    %17 = vector.load %arg3[%c0_8, %c0_9] : memref<128x16xf32, #tpu.memory_space<vmem>>, vector<128x16xf32>
    %cst_10 = arith.constant dense<0.000000e+00> : vector<128x128xf32>
    %18 = tpu.matmul %17, %13, %cst_10 {dimension_numbers = #tpu.dot_dimension_numbers<[1], [0], [0], [1], [0, 0, 1, 1], [], []>} : vector<128x16xf32>, vector<16x128xf32>, vector<128x128xf32> -> vector<128x128xf32>
    %19 = arith.addf %16, %18 : vector<128x128xf32>
    %c0_11 = arith.constant 0 : index
    %c0_12 = arith.constant 0 : index
    %20 = vector.load %arg5[%c0_11, %c0_12] : memref<1x128xf32, #tpu.memory_space<vmem>>, vector<1x128xf32>
    %21 = vector.broadcast %20 : vector<1x128xf32> to vector<128x128xf32>
    %22 = arith.addf %19, %21 : vector<128x128xf32>
    %c0_13 = arith.constant 0 : index
    %c0_14 = arith.constant 0 : index
    %23 = vector.load %arg6[%c0_13, %c0_14] : memref<128x128xf32, #tpu.memory_space<vmem>>, vector<128x128xf32>
    tpu.vector_store %arg6[%c0_13, %c0_14], %22 {strides = array<i32>} : memref<128x128xf32, #tpu.memory_space<vmem>>, vector<128x128xf32>,
    return
  }
  func.func @transform_0(%arg0: i32) -> (i32, i32) {
    %c0_i32 = arith.constant 0 : i32
    %c0_i32_0 = arith.constant 0 : i32
    return %arg0, %c0_i32 : i32, i32
  }
  func.func @transform_1(%arg0: i32) -> (i32, i32) {
    %c0_i32 = arith.constant 0 : i32
    %c0_i32_0 = arith.constant 0 : i32
    return %arg0, %c0_i32 : i32, i32
  }
  func.func @transform_2(%arg0: i32) -> (i32, i32) {
    %c0_i32 = arith.constant 0 : i32
    %c0_i32_0 = arith.constant 0 : i32
    return %arg0, %c0_i32 : i32, i32
  }
  func.func @transform_3(%arg0: i32) -> (i32, i32) {
    %c0_i32 = arith.constant 0 : i32
    %c0_i32_0 = arith.constant 0 : i32
    %c0_i32_1 = arith.constant 0 : i32
    return %c0_i32, %c0_i32_0 : i32, i32
  }
  func.func @transform_4(%arg0: i32) -> (i32, i32) {
    %c0_i32 = arith.constant 0 : i32
    %c0_i32_0 = arith.constant 0 : i32
    %c0_i32_1 = arith.constant 0 : i32
    return %c0_i32, %c0_i32_0 : i32, i32
  }
  func.func @transform_5(%arg0: i32) -> (i32, i32) {
    %c0_i32 = arith.constant 0 : i32
    %c0_i32_0 = arith.constant 0 : i32
    return %arg0, %c0_i32 : i32, i32
  }
}

</mosaic_0001>

<bundles_post_ra>
// kernel: tpu_custom_call.1
= control target key start
LH: loop header
LB: loop body
LE: loop exit
PB: predicated region body
PF: predicated region fallthrough
CT: control target
= control target key end

     0   :  { %10 = vsyncpa [#allocation3], 0  ;;  %s1633_s0 = inlined_call_operand.vmem [shape: s32[256,1], index: 0, kind: input, shape index: {}]   ;;  %s1634_s1 = inlined_call_operand.vmem [shape: s32[256,1], index: 1, kind: input, shape index: {}]   ;;  %s1635_s2 = inlined_call_operand.vmem [shape: f32[256,16], index: 2, kind: input, shape index: {}]   ;;  %s1636_s3 = inlined_call_operand.vmem [shape: f32[80,128], index: 3, kind: input, shape index: {}]   ;;  %s1637_s4 = inlined_call_operand.vmem [shape: f32[1,128], index: 4, kind: input, shape index: {}]   ;;  %s1638_s5 = inlined_call_operand.hbm [shape: f32[256,128], index: 5, kind: output, shape index: {}]  }
   0x1   :  { %12 = vsyncpa [#allocation3 + $0x1], 0  ;;  %s1269_s18 = smov 0   ;;  %s1271_s19 = smov 0  }
   0x2   :  { %s1273_s20 = smov 0   ;;  %s1275_s21 = smov 0  }
   0x3 LB: > { %s1290_s22 = sadd.s32 4294967295, %s1233_s21   ;;  %s1017_s23 = sadd.s32 4294967294, %s1233_s21   ;;  %s1233_s21 = sphi %s1275_s21, %s1644_s21   ;;  %s1229_s20 = sphi %s1273_s20, %s1643_s20   ;;  %s1225_s19 = sphi %s1271_s19, %s1642_s19   ;;  %s1221_s18 = sphi %s1269_s18, %s1641_s18  }
   0x4   : > { %s1294_s24 = sadd.s32 1, %s1233_s21   ;;  %s145_s25 = sadd.s32 1, %s1229_s20 }
   0x5   : > { %s142_s26 = ssub.s32 %s1233_s21, %s1294_s24  ;;  %p155_p0 = scmp.ne.s32.totalorder %s1229_s20, %s1225_s19 }
   0x6   : > { %p143_p1 = scmp.eq.s32.totalorder %s142_s26, 0  ;;  %p156_p2 = scmp.eq.s32.totalorder %s1290_s22, 1 }
   0x7   : > { %p161_p3 = scmp.ne.s32.totalorder %s1225_s19, %s1221_s18  ;;  %p162_p4 = scmp.eq.s32.totalorder %s1017_s23, 1 }
   0x8   : > { %s1305_s27 = scalar_select %p143_p1, %s1229_s20, %s145_s25  }
   0x9   : > { %p1307_p5 = por %p156_p2, %p155_p0  ;;  %p1311_p6 = por %p162_p4, %p161_p3 }
   0xa   : > { %p1020_p7 = scmp.ge.s32.totalorder %s1233_s21, 1  ;;  %p213_p8 = scmp.lt.s32.totalorder %s1233_s21, 3 }
   0xc   : > { %p214_p9 = pnand %p1020_p7, %p213_p8 }
   0xd   : > { %s1022_s30 = sshll.u32 (!%p214_p9), %s1290_s22, 4  ;;  %s1113_s10 = sshll.u32 (!%p214_p9), %s1290_s22, 7 }
   0xe   : > { %217 = sbr.rel (%p214_p9) target bundleno = 373 (0x175), region = 40  ;;  %p252_p10 = scmp.lt.s32.totalorder (!%p214_p9), %s1022_s30, 31 }
   0xf   : > { %s927_s14 = scalar_lea.hbm (!%p214_p9), %s1638_s5, %s1113_s10  ;;  %s1191_s26 = scalar_lea.hbm (!%p214_p9), %s1638_s5, 256 }
  0x13   : > { %v1235_v0 = vmov 0   ;;  %s1646_s30 = smov (!%p252_p10, %s1022_s30), 31  ;;  %v1345_v10 = vld [vmem:[%s1636_s3 + $0x48] sm:$0xff]  ;;  %v1350_v11 = vld [vmem:[%s1636_s3 + $0x40] sm:$0xff]  ;;  %vm749_vm0 = vcmask 130048   ;;  %v503_v40 = vld [vmem:[%s1636_s3 + $0x38] sm:$0xff]  ;;  %v270_v56 = vlaneseq }
  0x14   : > { %1169 = vset.pattern.permute.xlu2 %v1235_v0  ;;  %1168 = vset.pattern.permute.xlu1 %v1235_v0  ;;  %s1023_s6 = sshll.u32 %s1646_s30, 3  ;;  %v499_v41 = vld [vmem:[%s1636_s3 + $0x18] sm:$0xff]  ;;  %v502_v44 = vld [vmem:[%s1636_s3 + $0x30] sm:$0xff]  ;;  %v501_v47 = vld [vmem:[%s1636_s3 + $0x28] sm:$0xff]  ;;  %vm506_vm1 = vcmask 261120   ;;  %v1236_v62 = vmov 0.0  }
  0x15   : > { %1167 = vset.pattern.permute.xlu0 %v1235_v0  ;;  %s1321_s9 = scalar_lea.vmem %s1634_s1, %s1023_s6  ;;  %s1326_s12 = scalar_lea.vmem %s1633_s0, %s1023_s6  ;;  %812 = vmatpush.msra.mxu2 %v1345_v10  ;;  %v498_v45 = vld [vmem:[%s1636_s3 + $0x10] sm:$0xff]  ;;  %v497_v48 = vld [vmem:[%s1636_s3 + $0x8] sm:$0xff]  ;;  %v500_v49 = vld [vmem:[%s1636_s3 + $0x20] sm:$0xff]  ;;  %v1424_v58 = vand.u32 127, %v270_v56 }
  0x16   : > { %v396_v1 = vld [vmem:[%s1321_s9 + $0x60] sm:$0xff]  ;;  %v385_v2 = vld [vmem:[%s1321_s9 + $0x8] sm:$0xff]  ;;  %v398_v7 = vld [vmem:[%s1321_s9 + $0x70] sm:$0xff]  ;;  %s1340_s15 = scalar_lea.vmem %s1635_s2, %s1023_s6  ;;  %1114 = vmatpush.msra.mxu3 %v503_v40  ;;  %680 = vmatpush.msra.mxu1 %v499_v41 }
  0x17   : > { %v272_v3 = vld [vmem:[%s1326_s12] sm:$0xff]  ;;  %437 = vperm.xlu1 %1168, %v396_v1   ;;  %404 = vperm.xlu2 %1169, %v385_v2   ;;  %v397_v4 = vld [vmem:[%s1321_s9 + $0x68] sm:$0xff]  ;;  %v386_v8 = vld [vmem:[%s1321_s9 + $0x10] sm:$0xff] }
  0x18   : > { %289 = vperm.xlu0 %1167, %v272_v3   ;;  %v273_v5 = vld [vmem:[%s1326_s12 + $0x8] sm:$0xff]  ;;  %v384_v6 = vld [vmem:[%s1321_s9] sm:$0xff]  ;;  %v274_v9 = vld [vmem:[%s1326_s12 + $0x10] sm:$0xff]  ;;  %813 = vmatpush.msra.mxu2 %v1350_v11 }
  0x19   : > { %v733_v12 = vld [vmem:[%s1340_s15] sm:$0xff]  ;;  %v399_v13 = vld [vmem:[%s1321_s9 + $0x78] sm:$0xff]  ;;  %v734_v16 = vld [vmem:[%s1340_s15 + $0x8] sm:$0xff]  ;;  %567 = vmatpush.msra.mxu0 %v503_v40  ;;  %1115 = vmatpush.msra.mxu3 %v502_v44 }
  0x1a   : > { %v387_v14 = vld [vmem:[%s1321_s9 + $0x18] sm:$0xff]  ;;  %1092 = vmatmul.msk.f32.vlgmr.msra.gmra.mxu2 %vm749_vm0, %v733_v12  ;;  %v284_v17 = vld [vmem:[%s1326_s12 + $0x60] sm:$0xff]  ;;  %v735_v20 = vld [vmem:[%s1340_s15 + $0x10] sm:$0xff]  ;;  %681 = vmatpush.msra.mxu1 %v498_v45 }
  0x1b   : > { %v275_v15 = vld [vmem:[%s1326_s12 + $0x18] sm:$0xff]  ;;  %v388_v18 = vld [vmem:[%s1321_s9 + $0x20] sm:$0xff]  ;;  %v285_v21 = vld [vmem:[%s1326_s12 + $0x68] sm:$0xff]  ;;  %568 = vmatpush.msra.mxu0 %v502_v44  ;;  %1116 = vmatpush.msra.mxu3 %v501_v47 }
  0x1c   : > { %v276_v19 = vld [vmem:[%s1326_s12 + $0x20] sm:$0xff]  ;;  %v389_v22 = vld [vmem:[%s1321_s9 + $0x28] sm:$0xff]  ;;  %v736_v24 = vld [vmem:[%s1340_s15 + $0x18] sm:$0xff]  ;;  %682 = vmatpush.msra.mxu1 %v497_v48 }
  0x1d   : > { %v277_v23 = vld [vmem:[%s1326_s12 + $0x28] sm:$0xff]  ;;  %v286_v25 = vld [vmem:[%s1326_s12 + $0x70] sm:$0xff]  ;;  %v737_v28 = vld [vmem:[%s1340_s15 + $0x20] sm:$0xff]  ;;  %569 = vmatpush.msra.mxu0 %v501_v47  ;;  %1117 = vmatpush.msra.mxu3 %v500_v49 }
  0x1e   : > { %v390_v26 = vld [vmem:[%s1321_s9 + $0x30] sm:$0xff]  ;;  %v287_v29 = vld [vmem:[%s1326_s12 + $0x78] sm:$0xff]  ;;  %v738_v32 = vld [vmem:[%s1340_s15 + $0x28] sm:$0xff] }
  0x1f   : > { %440 = vperm.xlu2 %1169, %v397_v4   ;;  %292 = vperm.xlu1 %1168, %v273_v5   ;;  %v278_v27 = vld [vmem:[%s1326_s12 + $0x30] sm:$0xff]  ;;  %v391_v30 = vld [vmem:[%s1321_s9 + $0x38] sm:$0xff]  ;;  %v281_v33 = vld [vmem:[%s1326_s12 + $0x48] sm:$0xff] }
  0x20   : > { %401 = vperm.xlu0 %1167, %v384_v6   ;;  %v279_v31 = vld [vmem:[%s1326_s12 + $0x38] sm:$0xff]  ;;  %v392_v34 = vld [vmem:[%s1321_s9 + $0x40] sm:$0xff]  ;;  %v739_v36 = vld [vmem:[%s1340_s15 + $0x30] sm:$0xff]  ;;  %570 = vmatpush.msra.mxu0 %v500_v49 }
  0x21   : > { %v280_v35 = vld [vmem:[%s1326_s12 + $0x40] sm:$0xff]  ;;  %v394_v37 = vld [vmem:[%s1321_s9 + $0x50] sm:$0xff]  ;;  %v393_v39 = vld [vmem:[%s1321_s9 + $0x48] sm:$0xff]  ;;  %1118 = vmatpush.msrb.mxu3 %v499_v41 }
  0x22   : > { %1093 = vmatmul.msk.f32.gmra.mxu2 %vm749_vm0, %v734_v16  ;;  %v282_v38 = vld [vmem:[%s1326_s12 + $0x50] sm:$0xff]  ;;  %v740_v42 = vld [vmem:[%s1340_s15 + $0x38] sm:$0xff]  ;;  %v496_v50 = vld [vmem:[%s1636_s3] sm:$0xff] }
  0x23   : > { %v395_v43 = vld [vmem:[%s1321_s9 + $0x58] sm:$0xff]  ;;  %683 = vmatpush.msra.mxu1 %v496_v50  ;;  %v741_v51 = vld [vmem:[%s1340_s15 + $0x40] sm:$0xff]  ;;  %1119 = vmatpush.msrb.mxu3 %v498_v45  ;;  %v742_v52 = vld [vmem:[%s1340_s15 + $0x48] sm:$0xff]  ;;  %s930_s9 = sshll.u32 %s927_s14, 4  ;;  %s931_s9 = int_to_ptr.hbm [resolvable:$true] %s930_s9 }
  0x24   : > { %v283_v46 = vld [vmem:[%s1326_s12 + $0x58] sm:$0xff]  ;;  %v743_v54 = vld [vmem:[%s1340_s15 + $0x50] sm:$0xff]  ;;  %v745_v1 = vld [vmem:[%s1340_s15 + $0x60] sm:$0xff]  ;;  %s1185_s17 = sshra.s32 %s931_s9, 4  ;;  %s1186_s17 = int_to_ptr.hbm [resolvable:$true] %s1185_s17 }
  0x25   : > { %1120 = vmatpush.msrb.mxu3 %v497_v48  ;;  %v744_v57 = vld [vmem:[%s1340_s15 + $0x58] sm:$0xff]  ;;  %v746_v44 = vld [vmem:[%s1340_s15 + $0x68] sm:$0xff]  ;;  %s1187_s12 = scalar_lea.hbm %s1186_s17, 128  ;;  %p1192_p0 = scmp.lt.s32.totalorder %s1186_s17, %s1638_s5 }
  0x26   : > { %p1188_p11 = scmp.ne.s32.totalorder %s1186_s17, %s1187_s12  ;;  %p1193_p1 = scmp.lt.s32.totalorder %s1191_s26, %s1187_s12 }
  0x27   : > { %443 = vperm.xlu2 %1169, %v398_v7   ;;  %407 = vperm.xlu1 %1168, %v386_v8  }
  0x28   : > { %295 = vperm.xlu0 %1167, %v274_v9   ;;  %1121 = vmatpush.msrb.mxu3 %v496_v50  ;;  %p1189_p12 = pnand %p1188_p11, %p1307_p5  ;;  %p1194_p2 = por %p1193_p1, %p1192_p0 }
  0x2a   : > { %1094 = vmatmul.msk.f32.gmra.mxu2 %vm749_vm0, %v735_v20  ;;  %p1190_p13 = pneg %p1189_p12 }
  0x2c   : > { %p1195_p3 = pnand %p1194_p2, %p1190_p13 }
  0x2f   : > { %446 = vperm.xlu2 %1169, %v399_v13   ;;  %410 = vperm.xlu1 %1168, %v387_v14  }
  0x30   : > { %298 = vperm.xlu0 %1167, %v275_v15  }
  0x32   : > { %1095 = vmatmul.msk.f32.gmra.mxu2 %vm749_vm0, %v736_v24 }
  0x37   : > { %325 = vperm.xlu2 %1169, %v284_v17   ;;  %413 = vperm.xlu1 %1168, %v388_v18  }
  0x38   : > { %301 = vperm.xlu0 %1167, %v276_v19  }
  0x3a   : > { %1096 = vmatmul.msk.f32.gmra.mxu2 %vm749_vm0, %v737_v28 }
  0x3f   : > { %328 = vperm.xlu2 %1169, %v285_v21   ;;  %416 = vperm.xlu1 %1168, %v389_v22  }
  0x40   : > { %304 = vperm.xlu0 %1167, %v277_v23  }
  0x42   : > { %1097 = vmatmul.msk.f32.gmra.mxu2 %vm749_vm0, %v738_v32 }
  0x47   : > { %331 = vperm.xlu2 %1169, %v286_v25   ;;  %419 = vperm.xlu1 %1168, %v390_v26  }
  0x48   : > { %307 = vperm.xlu0 %1167, %v278_v27  }
  0x4a   : > { %1098 = vmatmul.msk.f32.gmra.mxu2 %vm749_vm0, %v739_v36 }
  0x4f   : > { %334 = vperm.xlu2 %1169, %v287_v29   ;;  %422 = vperm.xlu1 %1168, %v391_v30  }
  0x50   : > { %310 = vperm.xlu0 %1167, %v279_v31  }
  0x52   : > { %1099 = vmatmul.msk.f32.gmra.mxu2 %vm749_vm0, %v740_v42 }
  0x57   : > { %316 = vperm.xlu2 %1169, %v281_v33   ;;  %425 = vperm.xlu1 %1168, %v392_v34  }
  0x58   : > { %313 = vperm.xlu0 %1167, %v280_v35  }
  0x5a   : > { %1100 = vmatmul.msk.f32.gmra.mxu2 %vm749_vm0, %v741_v51  ;;  %v747_v51 = vld [vmem:[%s1340_s15 + $0x70] sm:$0xff] }
  0x5f   : > { %431 = vperm.xlu2 %1169, %v394_v37   ;;  %319 = vperm.xlu1 %1168, %v282_v38  }
  0x60   : > { %428 = vperm.xlu0 %1167, %v393_v39  }
  0x62   : > { %1101 = vmatmul.msk.f32.gmra.mxu2 %vm749_vm0, %v742_v52 }
  0x67   : > { %434 = vperm.xlu1 %1168, %v395_v43  }
  0x68   : > { %322 = vperm.xlu0 %1167, %v283_v46  }
  0x6a   : > { %1102 = vmatmul.msk.f32.gmra.mxu2 %vm749_vm0, %v743_v54 }
  0x71   : > { %v405_v53 = vpop.permute.xlu2 %404 }
  0x72   : > { %1103 = vmatmul.msk.f32.gmra.mxu2 %vm749_vm0, %v744_v57  ;;  %vm449_vm8 = vcmp.eq.s32.totalorder %v405_v53, %v1424_v58  ;;  %v748_v57 = vld [vmem:[%s1340_s15 + $0x78] sm:$0xff]  ;;  %s248_s15 = sand.u32 1, %s1225_s19  }
  0x73   : > { %s1021_s30 = sshll.u32 %s248_s15, 7  ;;  %s916_s22 = scalar_lea.sflag [#allocation3], %s248_s15 }
  0x74   : > { %s1555_s8 = scalar_lea.vmem [#allocation2], %s1021_s30 }
  0x75   : > { %s928_s16 = sshll.u32 %s1555_s8, 4  ;;  %s929_s16 = int_to_ptr.vmem [resolvable:$true] %s928_s16 }
  0x79   : > { %v441_v55 = vpop.permute.xlu2 %440 }
  0x7a   : > { %vm461_vm4 = vcmp.eq.s32.totalorder %v441_v55, %v1424_v58  ;;  %1104 = vmatmul.msk.f32.gmra.mxu2 %vm749_vm0, %v745_v1 }
  0x7b   : > { %v1057_v2 = vsel %vm461_vm4, 1.0, %v1236_v62 }
  0x81   : > { %v444_v61 = vpop.permute.xlu2 %443 }
  0x82   : > { %vm462_vm7 = vcmp.eq.s32.totalorder %v444_v61, %v1424_v58 }
  0x89   : > { %v438_v59 = vpop.permute.xlu1 %437  ;;  %v447_v7 = vpop.permute.xlu2 %446 }
  0x8a   : > { %vm460_vm2 = vcmp.eq.s32.totalorder %v438_v59, %v1424_v58  ;;  %v290_v60 = vpop.permute.xlu0 %289  ;;  %vm463_vm10 = vcmp.eq.s32.totalorder %v447_v7, %v1424_v58 }
  0x8b   : > { %v1056_v63 = vsel %vm460_vm2, 1.0, %v1236_v62  ;;  %vm336_vm3 = vcmp.eq.s32.totalorder %v290_v60, %v1424_v58  ;;  %v1059_v16 = vsel %vm463_vm10, 1.0, %v1236_v62 }
  0x8c   : > { %v1028_v0 = vsel %vm336_vm3, 1.0, %v1236_v62  ;;  %1072 = vmatmul.msk.f32.vlgmr.msra.gmra.mxu3 %vm506_vm1, %v1056_v63 }
  0x8d   : > { %1076 = vmatmul.msk.f32.vlgmr.msra.gmra.mxu1 %vm506_vm1, %v1028_v0  ;;  %1122 = vmatpush.msra.mxu3 %v1345_v10  ;;  %v1058_v10 = vsel %vm462_vm7, 1.0, %v1236_v62 }
  0x8f   : > { %1123 = vmatpush.msra.mxu3 %v1350_v11  ;;  %v1045_v11 = vsel %vm449_vm8, 1.0, %v1236_v62 }
  0x91   : > { %v293_v3 = vpop.permute.xlu1 %292  ;;  %v326_v13 = vpop.permute.xlu2 %325 }
  0x92   : > { %vm337_vm5 = vcmp.eq.s32.totalorder %v293_v3, %v1424_v58  ;;  %v402_v4 = vpop.permute.xlu0 %401  ;;  %vm348_vm13 = vcmp.eq.s32.totalorder %v326_v13, %v1424_v58 }
  0x93   : > { %v1029_v5 = vsel %vm337_vm5, 1.0, %v1236_v62  ;;  %vm448_vm6 = vcmp.eq.s32.totalorder %v402_v4, %v1424_v58  ;;  %v1040_v22 = vsel %vm348_vm13, 1.0, %v1236_v62 }
  0x94   : > { %v1044_v6 = vsel %vm448_vm6, 1.0, %v1236_v62  ;;  %1073 = vmatmul.msk.f32.gmra.mxu3 %vm506_vm1, %v1057_v2 }
  0x95   : > { %1060 = vmatmul.msk.f32.vlgmr.msra.gmra.mxu0 %vm506_vm1, %v1044_v6  ;;  %1077 = vmatmul.msk.f32.gmra.mxu1 %vm506_vm1, %v1029_v5 }
  0x99   : > { %v408_v8 = vpop.permute.xlu1 %407  ;;  %v329_v19 = vpop.permute.xlu2 %328 }
  0x9a   : > { %v296_v9 = vpop.permute.xlu0 %295  ;;  %vm450_vm11 = vcmp.eq.s32.totalorder %v408_v8, %v1424_v58  ;;  %vm349_vm2 = vcmp.eq.s32.totalorder %v329_v19, %v1424_v58 }
  0x9b   : > { %vm338_vm9 = vcmp.eq.s32.totalorder %v296_v9, %v1424_v58  ;;  %v1046_v17 = vsel %vm450_vm11, 1.0, %v1236_v62  ;;  %v1041_v27 = vsel %vm349_vm2, 1.0, %v1236_v62 }
  0x9c   : > { %v1030_v12 = vsel %vm338_vm9, 1.0, %v1236_v62  ;;  %1074 = vmatmul.msk.f32.gmra.mxu3 %vm506_vm1, %v1058_v10 }
  0x9d   : > { %1061 = vmatmul.msk.f32.gmra.mxu0 %vm506_vm1, %v1045_v11  ;;  %1078 = vmatmul.msk.f32.gmra.mxu1 %vm506_vm1, %v1030_v12  ;;  %v1482_v31 = vpop.f32.mrf.mxu2 }
  0xa1   : > { %v411_v14 = vpop.permute.xlu1 %410  ;;  %v332_v28 = vpop.permute.xlu2 %331 }
  0xa2   : > { %v299_v15 = vpop.permute.xlu0 %298  ;;  %vm451_vm14 = vcmp.eq.s32.totalorder %v411_v14, %v1424_v58  ;;  %vm350_vm5 = vcmp.eq.s32.totalorder %v332_v28, %v1424_v58 }
  0xa3   : > { %vm339_vm12 = vcmp.eq.s32.totalorder %v299_v15, %v1424_v58  ;;  %v1047_v23 = vsel %vm451_vm14, 1.0, %v1236_v62  ;;  %v1042_v34 = vsel %vm350_vm5, 1.0, %v1236_v62 }
  0xa4   : > { %v1031_v18 = vsel %vm339_vm12, 1.0, %v1236_v62  ;;  %1075 = vmatmul.msk.f32.gmra.mxu3 %vm506_vm1, %v1059_v16 }
  0xa5   : > { %1062 = vmatmul.msk.f32.gmra.mxu0 %vm506_vm1, %v1046_v17  ;;  %1079 = vmatmul.msk.f32.gmra.mxu1 %vm506_vm1, %v1031_v18  ;;  %v1495_v38 = vpop.f32.mrf.mxu2 }
  0xa9   : > { %v414_v20 = vpop.permute.xlu1 %413  ;;  %v335_v37 = vpop.permute.xlu2 %334 }
  0xaa   : > { %v302_v21 = vpop.permute.xlu0 %301  ;;  %vm452_vm3 = vcmp.eq.s32.totalorder %v414_v20, %v1424_v58  ;;  %vm351_vm8 = vcmp.eq.s32.totalorder %v335_v37, %v1424_v58 }
  0xab   : > { %vm340_vm15 = vcmp.eq.s32.totalorder %v302_v21, %v1424_v58  ;;  %v1048_v29 = vsel %vm452_vm3, 1.0, %v1236_v62  ;;  %v1043_v41 = vsel %vm351_vm8, 1.0, %v1236_v62 }
  0xac   : > { %v1032_v24 = vsel %vm340_vm15, 1.0, %v1236_v62  ;;  %1088 = vmatmul.msk.f32.vlgmr.msrb.gmra.mxu3 %vm506_vm1, %v1040_v22 }
  0xad   : > { %1063 = vmatmul.msk.f32.gmra.mxu0 %vm506_vm1, %v1047_v23  ;;  %1080 = vmatmul.msk.f32.gmra.mxu1 %vm506_vm1, %v1032_v24  ;;  %v1507_v46 = vpop.f32.mrf.mxu2 }
  0xb1   : > { %v417_v25 = vpop.permute.xlu1 %416  ;;  %v317_v50 = vpop.permute.xlu2 %316 }
  0xb2   : > { %v305_v26 = vpop.permute.xlu0 %304  ;;  %vm453_vm6 = vcmp.eq.s32.totalorder %v417_v25, %v1424_v58  ;;  %vm345_vm13 = vcmp.eq.s32.totalorder %v317_v50, %v1424_v58 }
  0xb3   : > { %vm341_vm4 = vcmp.eq.s32.totalorder %v305_v26, %v1424_v58  ;;  %v1049_v35 = vsel %vm453_vm6, 1.0, %v1236_v62  ;;  %v1037_v52 = vsel %vm345_vm13, 1.0, %v1236_v62 }
  0xb4   : > { %v1033_v30 = vsel %vm341_vm4, 1.0, %v1236_v62  ;;  %1089 = vmatmul.msk.f32.gmra.mxu3 %vm506_vm1, %v1041_v27 }
  0xb5   : > { %1064 = vmatmul.msk.f32.gmra.mxu0 %vm506_vm1, %v1048_v29  ;;  %1081 = vmatmul.msk.f32.gmra.mxu1 %vm506_vm1, %v1033_v30  ;;  %v824_v55 = vpop.f32.mrf.mxu2 }
  0xb9   : > { %v420_v32 = vpop.permute.xlu1 %419  ;;  %v432_v61 = vpop.permute.xlu2 %431 }
  0xba   : > { %v308_v33 = vpop.permute.xlu0 %307  ;;  %vm454_vm9 = vcmp.eq.s32.totalorder %v420_v32, %v1424_v58  ;;  %vm458_vm3 = vcmp.eq.s32.totalorder %v432_v61, %v1424_v58 }
  0xbb   : > { %vm342_vm7 = vcmp.eq.s32.totalorder %v308_v33, %v1424_v58  ;;  %v1050_v42 = vsel %vm454_vm9, 1.0, %v1236_v62  ;;  %v1054_v1 = vsel %vm458_vm3, 1.0, %v1236_v62 }
  0xbc   : > { %v1034_v36 = vsel %vm342_vm7, 1.0, %v1236_v62  ;;  %1090 = vmatmul.msk.f32.gmra.mxu3 %vm506_vm1, %v1042_v34 }
  0xbd   : > { %1065 = vmatmul.msk.f32.gmra.mxu0 %vm506_vm1, %v1049_v35  ;;  %1082 = vmatmul.msk.f32.gmra.mxu1 %vm506_vm1, %v1034_v36  ;;  %v827_v0 = vpop.f32.mrf.mxu2 }
  0xc1   : > { %v423_v39 = vpop.permute.xlu1 %422 }
  0xc2   : > { %v311_v40 = vpop.permute.xlu0 %310  ;;  %vm455_vm11 = vcmp.eq.s32.totalorder %v423_v39, %v1424_v58 }
  0xc3   : > { %vm343_vm10 = vcmp.eq.s32.totalorder %v311_v40, %v1424_v58  ;;  %v1051_v47 = vsel %vm455_vm11, 1.0, %v1236_v62 }
  0xc4   : > { %v1035_v43 = vsel %vm343_vm10, 1.0, %v1236_v62  ;;  %1091 = vmatmul.msk.f32.gmra.mxu3 %vm506_vm1, %v1043_v41 }
  0xc5   : > { %1066 = vmatmul.msk.f32.gmra.mxu0 %vm506_vm1, %v1050_v42  ;;  %1083 = vmatmul.msk.f32.gmra.mxu1 %vm506_vm1, %v1035_v43  ;;  %v830_v4 = vpop.f32.mrf.mxu2 }
  0xc9   : > { %v426_v48 = vpop.permute.xlu1 %425 }
  0xca   : > { %v314_v45 = vpop.permute.xlu0 %313  ;;  %vm456_vm14 = vcmp.eq.s32.totalorder %v426_v48, %v1424_v58 }
  0xcb   : > { %vm344_vm12 = vcmp.eq.s32.totalorder %v314_v45, %v1424_v58  ;;  %v1052_v53 = vsel %vm456_vm14, 1.0, %v1236_v62 }
  0xcc   : > { %v1036_v49 = vsel %vm344_vm12, 1.0, %v1236_v62  ;;  %1105 = vmatmul.msk.f32.vlgmr.msra.gmra.mxu3 %vm749_vm0, %v746_v44 }
  0xcd   : > { %1067 = vmatmul.msk.f32.gmra.mxu0 %vm506_vm1, %v1051_v47  ;;  %1084 = vmatmul.msk.f32.gmra.mxu1 %vm506_vm1, %v1036_v49  ;;  %v833_v6 = vpop.f32.mrf.mxu2 }
  0xd1   : > { %v320_v56 = vpop.permute.xlu1 %319 }
  0xd2   : > { %v429_v54 = vpop.permute.xlu0 %428  ;;  %vm346_vm15 = vcmp.eq.s32.totalorder %v320_v56, %v1424_v58 }
  0xd3   : > { %vm457_vm2 = vcmp.eq.s32.totalorder %v429_v54, %v1424_v58  ;;  %v1038_v59 = vsel %vm346_vm15, 1.0, %v1236_v62 }
  0xd4   : > { %1106 = vmatmul.msk.f32.gmra.mxu3 %vm749_vm0, %v747_v51  ;;  %v1053_v60 = vsel %vm457_vm2, 1.0, %v1236_v62 }
  0xd5   : > { %1068 = vmatmul.msk.f32.gmra.mxu0 %vm506_vm1, %v1052_v53  ;;  %1085 = vmatmul.msk.f32.gmra.mxu1 %vm506_vm1, %v1037_v52  ;;  %v1539_v7 = vpop.f32.mrf.mxu2 }
  0xd9   : > { %v435_v3 = vpop.permute.xlu1 %434 }
  0xda   : > { %v323_v63 = vpop.permute.xlu0 %322 }
  0xdb   : > { %vm347_vm4 = vcmp.eq.s32.totalorder %v323_v63, %v1424_v58 }
  0xdc   : > { %1107 = vmatmul.msk.f32.gmra.mxu3 %vm749_vm0, %v748_v57  ;;  %v1039_v2 = vsel %vm347_vm4, 1.0, %v1236_v62  ;;  %vm459_vm0 = vcmp.eq.s32.totalorder %v435_v3, %v1424_v58 }
  0xdd   : > { %1069 = vmatmul.msk.f32.gmra.mxu0 %vm506_vm1, %v1053_v60  ;;  %1086 = vmatmul.msk.f32.gmra.mxu1 %vm506_vm1, %v1038_v59  ;;  %v1055_v5 = vsel %vm459_vm0, 1.0, %v1236_v62  ;;  %v1541_v8 = vpop.f32.mrf.mxu2  ;;  %v1551_v62 = vld [vmem:[%s1637_s4] ss:$0 sm:$0xff] }
  0xe5   : > { %1070 = vmatmul.msk.f32.gmra.mxu0 %vm506_vm1, %v1054_v1  ;;  %1087 = vmatmul.msk.f32.gmra.mxu1 %vm506_vm1, %v1039_v2  ;;  %v1544_v11 = vpop.f32.mrf.mxu2 }
  0xed   : > { %1071 = vmatmul.msk.f32.gmra.mxu0 %vm506_vm1, %v1055_v5  ;;  %v1558_v20 = vpop.f32.mrf.mxu2 }
  0xf5   : > { %v1564_v28 = vpop.f32.mrf.mxu2 }
  0xfd   : > { %v851_v37 = vpop.f32.mrf.mxu2 }
 0x10a   : > { %v685_v9 = vpop.f32.mrf.mxu1 }
 0x10f   : > { %v608_v10 = vpop.f32.mrf.mxu3 }
 0x112   : > { %v572_v12 = vpop.f32.mrf.mxu0  ;;  %v688_v13 = vpop.f32.mrf.mxu1 }
 0x113   : > { %v686_v58 = vadd.f32 %v685_v9, %v572_v12 }
 0x115   : > { %v863_v14 = vadd.f32 %v1482_v31, %v686_v58 }
 0x117   : > { %v883_v15 = vadd.f32 %v1551_v62, %v863_v14  ;;  %v611_v16 = vpop.f32.mrf.mxu3 }
 0x119   : > { %899 = vst [vmem:[%s1555_s8] sm:$0xff] %v883_v15 }
 0x11a   : > { %v575_v17 = vpop.f32.mrf.mxu0  ;;  %v691_v18 = vpop.f32.mrf.mxu1 }
 0x11b   : > { %v689_v19 = vadd.f32 %v688_v13, %v575_v17 }
 0x11d   : > { %v864_v21 = vadd.f32 %v1495_v38, %v689_v19 }
 0x11f   : > { %v884_v22 = vadd.f32 %v1551_v62, %v864_v21  ;;  %v614_v23 = vpop.f32.mrf.mxu3 }
 0x121   : > { %900 = vst [vmem:[%s1555_s8 + $0x8] sm:$0xff] %v884_v22 }
 0x122   : > { %v578_v24 = vpop.f32.mrf.mxu0  ;;  %v694_v25 = vpop.f32.mrf.mxu1 }
 0x123   : > { %v692_v26 = vadd.f32 %v691_v18, %v578_v24 }
 0x125   : > { %v865_v27 = vadd.f32 %v1507_v46, %v692_v26 }
 0x127   : > { %v885_v29 = vadd.f32 %v1551_v62, %v865_v27  ;;  %v617_v30 = vpop.f32.mrf.mxu3 }
 0x129   : > { %901 = vst [vmem:[%s1555_s8 + $0x10] sm:$0xff] %v885_v29 }
 0x12a   : > { %v581_v31 = vpop.f32.mrf.mxu0  ;;  %v697_v32 = vpop.f32.mrf.mxu1 }
 0x12b   : > { %v695_v33 = vadd.f32 %v694_v25, %v581_v31 }
 0x12d   : > { %v866_v34 = vadd.f32 %v824_v55, %v695_v33 }
 0x12f   : > { %v886_v35 = vadd.f32 %v1551_v62, %v866_v34  ;;  %v721_v36 = vpop.f32.mrf.mxu3 }
 0x130   : > { %v722_v38 = vadd.f32 %v721_v36, %v608_v10 }
 0x131   : > { %902 = vst [vmem:[%s1555_s8 + $0x18] sm:$0xff] %v886_v35 }
 0x132   : > { %v584_v39 = vpop.f32.mrf.mxu0  ;;  %v700_v40 = vpop.f32.mrf.mxu1  ;;  %v875_v41 = vadd.f32 %v851_v37, %v722_v38 }
 0x133   : > { %v698_v42 = vadd.f32 %v697_v32, %v584_v39 }
 0x134   : > { %v895_v43 = vadd.f32 %v1551_v62, %v875_v41 }
 0x135   : > { %v867_v44 = vadd.f32 %v827_v0, %v698_v42 }
 0x136   : > { %911 = vst [vmem:[%s1555_s8 + $0x60] sm:$0xff] %v895_v43 }
 0x137   : > { %v887_v45 = vadd.f32 %v1551_v62, %v867_v44  ;;  %v724_v46 = vpop.f32.mrf.mxu3 }
 0x138   : > { %v725_v1 = vadd.f32 %v724_v46, %v611_v16 }
 0x139   : > { %903 = vst [vmem:[%s1555_s8 + $0x20] sm:$0xff] %v887_v45 }
 0x13a   : > { %v587_v47 = vpop.f32.mrf.mxu0  ;;  %v703_v48 = vpop.f32.mrf.mxu1 }
 0x13b   : > { %v701_v49 = vadd.f32 %v700_v40, %v587_v47 }
 0x13d   : > { %v868_v50 = vadd.f32 %v830_v4, %v701_v49 }
 0x13f   : > { %v888_v51 = vadd.f32 %v1551_v62, %v868_v50  ;;  %v727_v52 = vpop.f32.mrf.mxu3 }
 0x140   : > { %v728_v12 = vadd.f32 %v727_v52, %v614_v23 }
 0x141   : > { %904 = vst [vmem:[%s1555_s8 + $0x28] sm:$0xff] %v888_v51 }
 0x142   : > { %v590_v53 = vpop.f32.mrf.mxu0  ;;  %v706_v54 = vpop.f32.mrf.mxu1 }
 0x143   : > { %v704_v55 = vadd.f32 %v703_v48, %v590_v53 }
 0x145   : > { %v869_v56 = vadd.f32 %v833_v6, %v704_v55 }
 0x147   : > { %v889_v57 = vadd.f32 %v1551_v62, %v869_v56  ;;  %v730_v59 = vpop.f32.mrf.mxu3 }
 0x148   : > { %v731_v19 = vadd.f32 %v730_v59, %v617_v30 }
 0x149   : > { %905 = vst [vmem:[%s1555_s8 + $0x30] sm:$0xff] %v889_v57 }
 0x14a   : > { %v593_v60 = vpop.f32.mrf.mxu0  ;;  %v709_v63 = vpop.f32.mrf.mxu1 }
 0x14b   : > { %v707_v61 = vadd.f32 %v706_v54, %v593_v60 }
 0x14d   : > { %v870_v0 = vadd.f32 %v1539_v7, %v707_v61 }
 0x14f   : > { %v890_v2 = vadd.f32 %v1551_v62, %v870_v0  ;;  %v854_v3 = vpop.f32.mrf.mxu3 }
 0x150   : > { %v876_v4 = vadd.f32 %v854_v3, %v725_v1 }
 0x151   : > { %906 = vst [vmem:[%s1555_s8 + $0x38] sm:$0xff] %v890_v2 }
 0x152   : > { %v896_v5 = vadd.f32 %v1551_v62, %v876_v4  ;;  %v596_v6 = vpop.f32.mrf.mxu0  ;;  %v712_v13 = vpop.f32.mrf.mxu1 }
 0x153   : > { %v710_v9 = vadd.f32 %v709_v63, %v596_v6 }
 0x154   : > { %912 = vst [vmem:[%s1555_s8 + $0x68] sm:$0xff] %v896_v5 }
 0x155   : > { %v871_v10 = vadd.f32 %v1541_v8, %v710_v9 }
 0x157   : > { %v891_v7 = vadd.f32 %v1551_v62, %v871_v10  ;;  %v857_v58 = vpop.f32.mrf.mxu3 }
 0x158   : > { %v877_v14 = vadd.f32 %v857_v58, %v728_v12 }
 0x159   : > { %907 = vst [vmem:[%s1555_s8 + $0x40] sm:$0xff] %v891_v7 }
 0x15a   : > { %v897_v15 = vadd.f32 %v1551_v62, %v877_v14  ;;  %v599_v16 = vpop.f32.mrf.mxu0  ;;  %v715_v22 = vpop.f32.mrf.mxu1 }
 0x15b   : > { %v713_v17 = vadd.f32 %v712_v13, %v599_v16 }
 0x15c   : > { %913 = vst [vmem:[%s1555_s8 + $0x70] sm:$0xff] %v897_v15 }
 0x15d   : > { %v872_v18 = vadd.f32 %v1544_v11, %v713_v17 }
 0x15f   : > { %v892_v8 = vadd.f32 %v1551_v62, %v872_v18  ;;  %v860_v21 = vpop.f32.mrf.mxu3 }
 0x160   : > { %v878_v23 = vadd.f32 %v860_v21, %v731_v19 }
 0x161   : > { %908 = vst [vmem:[%s1555_s8 + $0x48] sm:$0xff] %v892_v8 }
 0x162   : > { %v898_v24 = vadd.f32 %v1551_v62, %v878_v23  ;;  %v602_v25 = vpop.f32.mrf.mxu0  ;;  %v718_v29 = vpop.f32.mrf.mxu1 }
 0x163   : > { %v716_v26 = vadd.f32 %v715_v22, %v602_v25 }
 0x164   : > { %914 = vst [vmem:[%s1555_s8 + $0x78] sm:$0xff] %v898_v24 }
 0x165   : > { %v873_v27 = vadd.f32 %v1558_v20, %v716_v26 }
 0x167   : > { %v893_v11 = vadd.f32 %v1551_v62, %v873_v27 }
 0x169   : > { %909 = vst [vmem:[%s1555_s8 + $0x50] sm:$0xff] %v893_v11 }
 0x16a   : > { %v605_v30 = vpop.f32.mrf.mxu0 }
 0x16b   : > { %v719_v31 = vadd.f32 %v718_v29, %v605_v30 }
 0x16d   : > { %v874_v32 = vadd.f32 %v1564_v28, %v719_v31 }
 0x16f   : > { %v894_v20 = vadd.f32 %v1551_v62, %v874_v32 }
 0x171   : > { %910 = vst [vmem:[%s1555_s8 + $0x58] sm:$0xff] %v894_v20 }
 0x172   : > { %1198 = shalt.err (!%p1195_p3)
}
 0x173   : > { %s1237_s15 = smov 128   ;;  %s1238_s7 = smov 8  }
 0x174   : > { %1124 = dma.vmem_to_hbm [thread:$0]  (%p1307_p5), %s929_s16, 2048, %s931_s9, %s916_s22, %s1237_s15, %s1237_s15, %s1238_s7  }
 0x175 PF: > { %p1130_p4 = scmp.ge.s32.totalorder %s1233_s21, 2  ;;  %s945_s8 = sand.u32 1, %s1221_s18  }
 0x176   : > { %s946_s10 = scalar_lea.sflag [#allocation3], %s945_s8 }
 0x177   : > { %p1127_p7 = pnand %p1130_p4, %p1311_p6 }
 0x179   : > { %p1128_p8 = pneg %p1127_p7 }
 0x17b   : > { %1216 = dma.done.wait (%p1128_p8), %s946_s10, 2048  }
 0x17c   : > { %1218 = vsyncadd (%p1128_p8), %s946_s10, 4294965248  ;;  %p15_p9 = scmp.ge.s32.totalorder %s1294_s24, 4   ;;  %s1641_s18 = smov %s1225_s19 }
 0x17d   : > { %s1642_s19 = smov %s1229_s20  ;;  %s1643_s20 = smov %s1305_s27 }
 0x17e   : > { %s1644_s21 = smov %s1294_s24  ;;  %17 = sbr.rel (!%p15_p9) target bundleno = 3 (0x3), region = 81 }
 0x183   :  { %952 = vsyncpa [#allocation3], 1 }
 0x184   :  { %954 = vsyncpa [#allocation3 + $0x1], 1 }

</bundles_post_ra>
